<compile_context>
chip_gen: v6e
topology: v6e:2x2x1
jax: 0.10.0
libtpu: 0.0.40
codegen_flags: <defaults>
</compile_context>

<pallas_src>
import jax
import jax.numpy as jnp
import numpy as np
from jax import lax
from jax.experimental import pallas as pl
from jax.experimental.pallas import tpu as pltpu

BETA = 0.95


def _leaky_step(x_t, mem, reset, uth):
    """One Leaky step. reset is the (already scaled) subtract term."""
    mem = BETA * mem + x_t - reset
    spk_b = mem > uth
    spk = jnp.where(spk_b, jnp.float32(1.0), jnp.float32(0.0))
    reset = jnp.where(spk_b, jnp.float32(uth), jnp.float32(0.0))
    return spk, mem, reset


def _make_grouped_kernel(uth: float, tb: int, t_total: int, t_divides: bool):
    """Kernel for 3-D blocks (tb, tn): groups 8 timesteps per dense store."""
    uth = float(uth)

    def kernel(x_ref, spk_ref, mem_ref):
        j = pl.program_id(2)

        @pl.when(j == 0)
        def _():
            mem_ref[...] = jnp.zeros_like(mem_ref)

        mem0 = mem_ref[...]                                           # (1, tn)
        reset0 = jnp.where(mem0 > uth, jnp.float32(uth), jnp.float32(0.0))

        if t_divides:
            n_full = tb // 8          # static
            rem = tb % 8              # static
        else:
            valid = jnp.minimum(tb, t_total - j * tb)                 # dynamic
            n_full = valid // 8
            rem = valid - n_full * 8

        def group_body(g, carry):
            mem, reset = carry
            t0 = pl.multiple_of(g * 8, 8)
            spks = []
            for i in range(8):                                        # unrolled
                x_t = x_ref[pl.ds(t0 + i, 1), :]                      # (1, tn)
                spk, mem, reset = _leaky_step(x_t, mem, reset, uth)
                spks.append(spk)
            # One dense, sublane-aligned (8, tn) store instead of 8 masked ones.
            spk_ref[pl.ds(t0, 8), :] = jnp.concatenate(spks, axis=0)
            return mem, reset

        carry = lax.fori_loop(0, n_full, group_body, (mem0, reset0))

        def tail_body(i, carry):
            mem, reset = carry
            t = n_full * 8 + i
            x_t = x_ref[pl.ds(t, 1), :]
            spk, mem, reset = _leaky_step(x_t, mem, reset, uth)
            spk_ref[pl.ds(t, 1), :] = spk
            return mem, reset

        if isinstance(rem, int) and rem == 0:
            mem_f, _ = carry
        else:
            mem_f, _ = lax.fori_loop(0, rem, tail_body, carry)

        mem_ref[...] = mem_f

    return kernel


def _make_folded_kernel(uth: float, tb: int, t_total: int, t_divides: bool):
    """Kernel for 4-D blocks (tb, nl, 128), nl % 8 == 0: per-step work is
    already full 8x128 vregs, so a simple per-timestep loop is dense."""
    uth = float(uth)

    def kernel(x_ref, spk_ref, mem_ref):
        j = pl.program_id(2)

        @pl.when(j == 0)
        def _():
            mem_ref[...] = jnp.zeros_like(mem_ref)

        mem0 = mem_ref[...]                                      # (1, nl, 128)
        reset0 = jnp.where(mem0 > uth, jnp.float32(uth), jnp.float32(0.0))

        def step(t, carry):
            mem, reset = carry
            x_t = x_ref[pl.ds(t, 1), :, :]                       # (1, nl, 128)
            spk, mem, reset = _leaky_step(x_t, mem, reset, uth)
            spk_ref[pl.ds(t, 1), :, :] = spk
            return mem, reset

        if t_divides:
            mem_f, _ = lax.fori_loop(0, tb, step, (mem0, reset0),
                                     unroll=min(8, tb))
        else:
            n_steps = jnp.minimum(tb, t_total - j * tb)
            mem_f, _ = lax.fori_loop(0, n_steps, step, (mem0, reset0))

        mem_ref[...] = mem_f

    return kernel


def auditory_nerve(inp, uth, *, time_block=None):
    """inp: (B, T, N) float32 currents -> (B, T, N) float32 spikes (0./1.)."""
    x = jnp.asarray(inp, dtype=jnp.float32)
    B, T, N = x.shape

    # --- N tiling (lane axis).  Split N only to feed the 2nd v7x TensorCore
    # when the batch axis cannot; on 1-TC chips this is neutral. ---
    if B == 1 and N % 256 == 0:
        tn = N // 2
    else:
        tn = N
    n_n = N // tn

    # Fold N into sublanes when a per-timestep slab fills whole (8,128) tiles.
    fold = (tn % 1024 == 0)

    # --- time block from a VMEM budget: in + out, double-buffered ---
    budget = 12 * 1024 * 1024                      # bytes; well under 32 MiB scoped
    tb = int(time_block) if time_block is not None else max(8, budget // (16 * tn))
    tb = min(tb, T)
    if tb < T:
        tb = max(8, (tb // 8) * 8)                 # (8, .) divisibility of block
    num_tb = -(-T // tb)                           # cdiv; ragged tail handled in-kernel
    t_divides = (T % tb == 0)

    if fold:
        nl_total = N // 128
        nl = tn // 128
        x_in = x.reshape(B, T, nl_total, 128)      # free, contiguous reshape
        block = (pl.Squeezed(), tb, nl, 128)
        index_map = lambda b, n, j: (b, j, n, 0)
        scratch = pltpu.VMEM((1, nl, 128), jnp.float32)
        kernel = _make_folded_kernel(uth, tb, T, t_divides)
        out_shape = jax.ShapeDtypeStruct((B, T, nl_total, 128), jnp.float32)
    else:
        x_in = x
        block = (pl.Squeezed(), tb, tn)
        index_map = lambda b, n, j: (b, j, n)
        scratch = pltpu.VMEM((1, tn), jnp.float32)
        kernel = _make_grouped_kernel(uth, tb, T, t_divides)
        out_shape = jax.ShapeDtypeStruct((B, T, N), jnp.float32)

    spikes = pl.pallas_call(
        kernel,
        out_shape=out_shape,
        grid_spec=pltpu.PrefetchScalarGridSpec(
            num_scalar_prefetch=0,
            grid=(B, n_n, num_tb),                 # recurrence (time) axis last
            in_specs=[pl.BlockSpec(block, index_map)],
            out_specs=pl.BlockSpec(block, index_map),
            scratch_shapes=[scratch],
        ),
        compiler_params=pltpu.CompilerParams(
            # batch / N-tile axes are independent -> parallel (megacore);
            # time carries the membrane state -> arbitrary.
            dimension_semantics=("parallel", "parallel", "arbitrary"),
            vmem_limit_bytes=32 * 1024 * 1024,     # safe on v5e/v6e/v7x
        ),
    )(x_in)

    return spikes.reshape(B, T, N)


def auditory_nerve_ref(inp: np.ndarray, uth: float) -> np.ndarray:
    """Pure-numpy reference of the snn.Leaky recurrence."""
    inp = np.asarray(inp, dtype=np.float32)
    B, T, N = inp.shape
    mem = np.zeros((B, N), dtype=np.float32)
    out = np.zeros((B, T, N), dtype=np.float32)
    for t in range(T):
        reset = (mem > uth).astype(np.float32)
        mem = BETA * mem + inp[:, t] - reset * uth
        out[:, t] = (mem > uth).astype(np.float32)
    return out


if __name__ == "__main__":
    key = jax.random.PRNGKey(0)
    uth = 1.0
    keys = jax.random.split(key, 5)

    cases = [
        # (B, T, N, time_block)
        (3, 24, 128, 8),       # multi time-block membrane carry, T % tb == 0
        (2, 20, 128, 8),       # ragged last time block (dynamic trip counts)
        (2, 19, 128, None),    # single block, tb == T not a multiple of 8 (tail path)
        (1, 16, 256, None),    # B == 1 -> parallel N-tile grid axis
        (2, 16, 1024, None),   # N folded into sublanes (dense-vreg path)
    ]

    for idx, (B, T, N, tblk) in enumerate(cases):
        inp = 1.5 * jax.random.uniform(keys[idx], (B, T, N), dtype=jnp.float32)
        out = jax.block_until_ready(auditory_nerve(inp, uth, time_block=tblk))
        ref = auditory_nerve_ref(np.asarray(inp), uth)
        assert out.shape == ref.shape, f"case {idx}: shape {out.shape} vs {ref.shape}"
        assert out.dtype == jnp.float32, f"case {idx}: dtype {out.dtype}"
        # Spikes are binary; allow only a vanishing fraction of threshold-boundary
        # flips (FMA/reassociation differences across TPU generations).
        mismatch = float(np.mean(np.asarray(out) != ref))
        assert mismatch < 1e-3, f"case {idx}: mismatch fraction {mismatch}"

    print("KERNEL_OK")
</pallas_src>

<mosaic_0001>
module attributes {stable_mosaic.version = 11 : i64} {
  func.func @kernel(%arg0: i32, %arg1: i32, %arg2: i32, %arg3: memref<1x8x128xf32, #tpu.memory_space<vmem>>, %arg4: memref<1x8x128xf32, #tpu.memory_space<vmem>>, %arg5: memref<1x128xf32, #tpu.memory_space<vmem>>) attributes {dimension_semantics = [#tpu.dimension_semantics<parallel>, #tpu.dimension_semantics<parallel>, #tpu.dimension_semantics<arbitrary>], iteration_bounds = array<i64: 3, 1, 3>, scalar_prefetch = 0 : i64, scratch_operands = 1 : i64, tpu.core_type = #tpu.core_type<tc>, window_params = [{transform_indices = @transform_0, window_bounds = array<i64: 1, 8, 128>}, {transform_indices = @transform_1, window_bounds = array<i64: 1, 8, 128>}]} {
    %c0_i32 = arith.constant 0 : i32
    %0 = arith.cmpi eq, %arg2, %c0_i32 : i32
    %1 = arith.extui %0 : i1 to i32
    %c0_i32_0 = arith.constant 0 : i32
    %2 = arith.cmpi ne, %1, %c0_i32_0 : i32
    scf.if %2 {
      %cst_75 = arith.constant 0.000000e+00 : f32
      %145 = vector.broadcast %cst_75 : f32 to vector<1x128xf32>
      %c0_76 = arith.constant 0 : index
      %c0_77 = arith.constant 0 : index
      %146 = vector.load %arg5[%c0_76, %c0_77] : memref<1x128xf32, #tpu.memory_space<vmem>>, vector<1x128xf32>
      tpu.vector_store %arg5[%c0_76, %c0_77], %145 {strides = array<i32>} : memref<1x128xf32, #tpu.memory_space<vmem>>, vector<1x128xf32>,
    } else {
    }
    %c0 = arith.constant 0 : index
    %c0_1 = arith.constant 0 : index
    %3 = vector.load %arg5[%c0, %c0_1] : memref<1x128xf32, #tpu.memory_space<vmem>>, vector<1x128xf32>
    %cst = arith.constant 1.000000e+00 : f32
    %4 = vector.broadcast %cst : f32 to vector<1x128xf32>
    %5 = arith.cmpf ogt, %3, %4 : vector<1x128xf32>
    %cst_2 = arith.constant 1.000000e+00 : f32
    %cst_3 = arith.constant 0.000000e+00 : f32
    %6 = vector.broadcast %cst_2 : f32 to vector<1x128xf32>
    %7 = vector.broadcast %cst_3 : f32 to vector<1x128xf32>
    %8 = arith.select %5, %6, %7 : vector<1x128xi1>, vector<1x128xf32>
    %c0_i32_4 = arith.constant 0 : i32
    %c8_i32 = arith.constant 8 : i32
    %9 = arith.muli %c0_i32_4, %c8_i32 : i32
    %10 = tpu.assume_multiple %9, 8 : i32
    %c0_i32_5 = arith.constant 0 : i32
    %11 = arith.addi %10, %c0_i32_5 : i32
    %c0_6 = arith.constant 0 : index
    %12 = arith.index_cast %11 : i32 to index
    %c0_7 = arith.constant 0 : index
    %13 = vector.load %arg3[%c0_6, %12, %c0_7] : memref<1x8x128xf32, #tpu.memory_space<vmem>>, vector<1x1x128xf32>
    %14 = vector.shape_cast %13 : vector<1x1x128xf32> to vector<1x128xf32>
    %cst_8 = arith.constant 0.949999988 : f32
    %15 = vector.broadcast %cst_8 : f32 to vector<1x128xf32>
    %16 = arith.mulf %15, %3 : vector<1x128xf32>
    %17 = arith.addf %16, %14 : vector<1x128xf32>
    %18 = arith.subf %17, %8 : vector<1x128xf32>
    %cst_9 = arith.constant 1.000000e+00 : f32
    %19 = vector.broadcast %cst_9 : f32 to vector<1x128xf32>
    %20 = arith.cmpf ogt, %18, %19 : vector<1x128xf32>
    %cst_10 = arith.constant 1.000000e+00 : f32
    %cst_11 = arith.constant 0.000000e+00 : f32
    %21 = vector.broadcast %cst_10 : f32 to vector<1x128xf32>
    %22 = vector.broadcast %cst_11 : f32 to vector<1x128xf32>
    %23 = arith.select %20, %21, %22 : vector<1x128xi1>, vector<1x128xf32>
    %cst_12 = arith.constant 1.000000e+00 : f32
    %cst_13 = arith.constant 0.000000e+00 : f32
    %24 = vector.broadcast %cst_12 : f32 to vector<1x128xf32>
    %25 = vector.broadcast %cst_13 : f32 to vector<1x128xf32>
    %26 = arith.select %20, %24, %25 : vector<1x128xi1>, vector<1x128xf32>
    %c1_i32 = arith.constant 1 : i32
    %27 = arith.addi %10, %c1_i32 : i32
    %c0_14 = arith.constant 0 : index
    %28 = arith.index_cast %27 : i32 to index
    %c0_15 = arith.constant 0 : index
    %29 = vector.load %arg3[%c0_14, %28, %c0_15] : memref<1x8x128xf32, #tpu.memory_space<vmem>>, vector<1x1x128xf32>
    %30 = vector.shape_cast %29 : vector<1x1x128xf32> to vector<1x128xf32>
    %cst_16 = arith.constant 0.949999988 : f32
    %31 = vector.broadcast %cst_16 : f32 to vector<1x128xf32>
    %32 = arith.mulf %31, %18 : vector<1x128xf32>
    %33 = arith.addf %32, %30 : vector<1x128xf32>
    %34 = arith.subf %33, %26 : vector<1x128xf32>
    %cst_17 = arith.constant 1.000000e+00 : f32
    %35 = vector.broadcast %cst_17 : f32 to vector<1x128xf32>
    %36 = arith.cmpf ogt, %34, %35 : vector<1x128xf32>
    %cst_18 = arith.constant 1.000000e+00 : f32
    %cst_19 = arith.constant 0.000000e+00 : f32
    %37 = vector.broadcast %cst_18 : f32 to vector<1x128xf32>
    %38 = vector.broadcast %cst_19 : f32 to vector<1x128xf32>
    %39 = arith.select %36, %37, %38 : vector<1x128xi1>, vector<1x128xf32>
    %cst_20 = arith.constant 1.000000e+00 : f32
    %cst_21 = arith.constant 0.000000e+00 : f32
    %40 = vector.broadcast %cst_20 : f32 to vector<1x128xf32>
    %41 = vector.broadcast %cst_21 : f32 to vector<1x128xf32>
    %42 = arith.select %36, %40, %41 : vector<1x128xi1>, vector<1x128xf32>
    %c2_i32 = arith.constant 2 : i32
    %43 = arith.addi %10, %c2_i32 : i32
    %c0_22 = arith.constant 0 : index
    %44 = arith.index_cast %43 : i32 to index
    %c0_23 = arith.constant 0 : index
    %45 = vector.load %arg3[%c0_22, %44, %c0_23] : memref<1x8x128xf32, #tpu.memory_space<vmem>>, vector<1x1x128xf32>
    %46 = vector.shape_cast %45 : vector<1x1x128xf32> to vector<1x128xf32>
    %cst_24 = arith.constant 0.949999988 : f32
    %47 = vector.broadcast %cst_24 : f32 to vector<1x128xf32>
    %48 = arith.mulf %47, %34 : vector<1x128xf32>
    %49 = arith.addf %48, %46 : vector<1x128xf32>
    %50 = arith.subf %49, %42 : vector<1x128xf32>
    %cst_25 = arith.constant 1.000000e+00 : f32
    %51 = vector.broadcast %cst_25 : f32 to vector<1x128xf32>
    %52 = arith.cmpf ogt, %50, %51 : vector<1x128xf32>
    %cst_26 = arith.constant 1.000000e+00 : f32
    %cst_27 = arith.constant 0.000000e+00 : f32
    %53 = vector.broadcast %cst_26 : f32 to vector<1x128xf32>
    %54 = vector.broadcast %cst_27 : f32 to vector<1x128xf32>
    %55 = arith.select %52, %53, %54 : vector<1x128xi1>, vector<1x128xf32>
    %cst_28 = arith.constant 1.000000e+00 : f32
    %cst_29 = arith.constant 0.000000e+00 : f32
    %56 = vector.broadcast %cst_28 : f32 to vector<1x128xf32>
    %57 = vector.broadcast %cst_29 : f32 to vector<1x128xf32>
    %58 = arith.select %52, %56, %57 : vector<1x128xi1>, vector<1x128xf32>
    %c3_i32 = arith.constant 3 : i32
    %59 = arith.addi %10, %c3_i32 : i32
    %c0_30 = arith.constant 0 : index
    %60 = arith.index_cast %59 : i32 to index
    %c0_31 = arith.constant 0 : index
    %61 = vector.load %arg3[%c0_30, %60, %c0_31] : memref<1x8x128xf32, #tpu.memory_space<vmem>>, vector<1x1x128xf32>
    %62 = vector.shape_cast %61 : vector<1x1x128xf32> to vector<1x128xf32>
    %cst_32 = arith.constant 0.949999988 : f32
    %63 = vector.broadcast %cst_32 : f32 to vector<1x128xf32>
    %64 = arith.mulf %63, %50 : vector<1x128xf32>
    %65 = arith.addf %64, %62 : vector<1x128xf32>
    %66 = arith.subf %65, %58 : vector<1x128xf32>
    %cst_33 = arith.constant 1.000000e+00 : f32
    %67 = vector.broadcast %cst_33 : f32 to vector<1x128xf32>
    %68 = arith.cmpf ogt, %66, %67 : vector<1x128xf32>
    %cst_34 = arith.constant 1.000000e+00 : f32
    %cst_35 = arith.constant 0.000000e+00 : f32
    %69 = vector.broadcast %cst_34 : f32 to vector<1x128xf32>
    %70 = vector.broadcast %cst_35 : f32 to vector<1x128xf32>
    %71 = arith.select %68, %69, %70 : vector<1x128xi1>, vector<1x128xf32>
    %cst_36 = arith.constant 1.000000e+00 : f32
    %cst_37 = arith.constant 0.000000e+00 : f32
    %72 = vector.broadcast %cst_36 : f32 to vector<1x128xf32>
    %73 = vector.broadcast %cst_37 : f32 to vector<1x128xf32>
    %74 = arith.select %68, %72, %73 : vector<1x128xi1>, vector<1x128xf32>
    %c4_i32 = arith.constant 4 : i32
    %75 = arith.addi %10, %c4_i32 : i32
    %c0_38 = arith.constant 0 : index
    %76 = arith.index_cast %75 : i32 to index
    %c0_39 = arith.constant 0 : index
    %77 = vector.load %arg3[%c0_38, %76, %c0_39] : memref<1x8x128xf32, #tpu.memory_space<vmem>>, vector<1x1x128xf32>
    %78 = vector.shape_cast %77 : vector<1x1x128xf32> to vector<1x128xf32>
    %cst_40 = arith.constant 0.949999988 : f32
    %79 = vector.broadcast %cst_40 : f32 to vector<1x128xf32>
    %80 = arith.mulf %79, %66 : vector<1x128xf32>
    %81 = arith.addf %80, %78 : vector<1x128xf32>
    %82 = arith.subf %81, %74 : vector<1x128xf32>
    %cst_41 = arith.constant 1.000000e+00 : f32
    %83 = vector.broadcast %cst_41 : f32 to vector<1x128xf32>
    %84 = arith.cmpf ogt, %82, %83 : vector<1x128xf32>
    %cst_42 = arith.constant 1.000000e+00 : f32
    %cst_43 = arith.constant 0.000000e+00 : f32
    %85 = vector.broadcast %cst_42 : f32 to vector<1x128xf32>
    %86 = vector.broadcast %cst_43 : f32 to vector<1x128xf32>
    %87 = arith.select %84, %85, %86 : vector<1x128xi1>, vector<1x128xf32>
    %cst_44 = arith.constant 1.000000e+00 : f32
    %cst_45 = arith.constant 0.000000e+00 : f32
    %88 = vector.broadcast %cst_44 : f32 to vector<1x128xf32>
    %89 = vector.broadcast %cst_45 : f32 to vector<1x128xf32>
    %90 = arith.select %84, %88, %89 : vector<1x128xi1>, vector<1x128xf32>
    %c5_i32 = arith.constant 5 : i32
    %91 = arith.addi %10, %c5_i32 : i32
    %c0_46 = arith.constant 0 : index
    %92 = arith.index_cast %91 : i32 to index
    %c0_47 = arith.constant 0 : index
    %93 = vector.load %arg3[%c0_46, %92, %c0_47] : memref<1x8x128xf32, #tpu.memory_space<vmem>>, vector<1x1x128xf32>
    %94 = vector.shape_cast %93 : vector<1x1x128xf32> to vector<1x128xf32>
    %cst_48 = arith.constant 0.949999988 : f32
    %95 = vector.broadcast %cst_48 : f32 to vector<1x128xf32>
    %96 = arith.mulf %95, %82 : vector<1x128xf32>
    %97 = arith.addf %96, %94 : vector<1x128xf32>
    %98 = arith.subf %97, %90 : vector<1x128xf32>
    %cst_49 = arith.constant 1.000000e+00 : f32
    %99 = vector.broadcast %cst_49 : f32 to vector<1x128xf32>
    %100 = arith.cmpf ogt, %98, %99 : vector<1x128xf32>
    %cst_50 = arith.constant 1.000000e+00 : f32
    %cst_51 = arith.constant 0.000000e+00 : f32
    %101 = vector.broadcast %cst_50 : f32 to vector<1x128xf32>
    %102 = vector.broadcast %cst_51 : f32 to vector<1x128xf32>
    %103 = arith.select %100, %101, %102 : vector<1x128xi1>, vector<1x128xf32>
    %cst_52 = arith.constant 1.000000e+00 : f32
    %cst_53 = arith.constant 0.000000e+00 : f32
    %104 = vector.broadcast %cst_52 : f32 to vector<1x128xf32>
    %105 = vector.broadcast %cst_53 : f32 to vector<1x128xf32>
    %106 = arith.select %100, %104, %105 : vector<1x128xi1>, vector<1x128xf32>
    %c6_i32 = arith.constant 6 : i32
    %107 = arith.addi %10, %c6_i32 : i32
    %c0_54 = arith.constant 0 : index
    %108 = arith.index_cast %107 : i32 to index
    %c0_55 = arith.constant 0 : index
    %109 = vector.load %arg3[%c0_54, %108, %c0_55] : memref<1x8x128xf32, #tpu.memory_space<vmem>>, vector<1x1x128xf32>
    %110 = vector.shape_cast %109 : vector<1x1x128xf32> to vector<1x128xf32>
    %cst_56 = arith.constant 0.949999988 : f32
    %111 = vector.broadcast %cst_56 : f32 to vector<1x128xf32>
    %112 = arith.mulf %111, %98 : vector<1x128xf32>
    %113 = arith.addf %112, %110 : vector<1x128xf32>
    %114 = arith.subf %113, %106 : vector<1x128xf32>
    %cst_57 = arith.constant 1.000000e+00 : f32
    %115 = vector.broadcast %cst_57 : f32 to vector<1x128xf32>
    %116 = arith.cmpf ogt, %114, %115 : vector<1x128xf32>
    %cst_58 = arith.constant 1.000000e+00 : f32
    %cst_59 = arith.constant 0.000000e+00 : f32
    %117 = vector.broadcast %cst_58 : f32 to vector<1x128xf32>
    %118 = vector.broadcast %cst_59 : f32 to vector<1x128xf32>
    %119 = arith.select %116, %117, %118 : vector<1x128xi1>, vector<1x128xf32>
    %cst_60 = arith.constant 1.000000e+00 : f32
    %cst_61 = arith.constant 0.000000e+00 : f32
    %120 = vector.broadcast %cst_60 : f32 to vector<1x128xf32>
    %121 = vector.broadcast %cst_61 : f32 to vector<1x128xf32>
    %122 = arith.select %116, %120, %121 : vector<1x128xi1>, vector<1x128xf32>
    %c7_i32 = arith.constant 7 : i32
    %123 = arith.addi %10, %c7_i32 : i32
    %c0_62 = arith.constant 0 : index
    %124 = arith.index_cast %123 : i32 to index
    %c0_63 = arith.constant 0 : index
    %125 = vector.load %arg3[%c0_62, %124, %c0_63] : memref<1x8x128xf32, #tpu.memory_space<vmem>>, vector<1x1x128xf32>
    %126 = vector.shape_cast %125 : vector<1x1x128xf32> to vector<1x128xf32>
    %cst_64 = arith.constant 0.949999988 : f32
    %127 = vector.broadcast %cst_64 : f32 to vector<1x128xf32>
    %128 = arith.mulf %127, %114 : vector<1x128xf32>
    %129 = arith.addf %128, %126 : vector<1x128xf32>
    %130 = arith.subf %129, %122 : vector<1x128xf32>
    %cst_65 = arith.constant 1.000000e+00 : f32
    %131 = vector.broadcast %cst_65 : f32 to vector<1x128xf32>
    %132 = arith.cmpf ogt, %130, %131 : vector<1x128xf32>
    %cst_66 = arith.constant 1.000000e+00 : f32
    %cst_67 = arith.constant 0.000000e+00 : f32
    %133 = vector.broadcast %cst_66 : f32 to vector<1x128xf32>
    %134 = vector.broadcast %cst_67 : f32 to vector<1x128xf32>
    %135 = arith.select %132, %133, %134 : vector<1x128xi1>, vector<1x128xf32>
    %cst_68 = arith.constant 1.000000e+00 : f32
    %cst_69 = arith.constant 0.000000e+00 : f32
    %136 = vector.broadcast %cst_68 : f32 to vector<1x128xf32>
    %137 = vector.broadcast %cst_69 : f32 to vector<1x128xf32>
    %138 = arith.select %132, %136, %137 : vector<1x128xi1>, vector<1x128xf32>
    %139 = tpu.concatenate %23, %39, %55, %71, %87, %103, %119, %135 in 0 : vector<1x128xf32>, vector<1x128xf32>, vector<1x128xf32>, vector<1x128xf32>, vector<1x128xf32>, vector<1x128xf32>, vector<1x128xf32>, vector<1x128xf32> -> vector<8x128xf32>
    %c0_70 = arith.constant 0 : index
    %140 = arith.index_cast %10 : i32 to index
    %c0_71 = arith.constant 0 : index
    %141 = vector.load %arg4[%c0_70, %140, %c0_71] : memref<1x8x128xf32, #tpu.memory_space<vmem>>, vector<1x8x128xf32>
    %142 = vector.shape_cast %141 : vector<1x8x128xf32> to vector<8x128xf32>
    %143 = vector.shape_cast %139 : vector<8x128xf32> to vector<1x8x128xf32>
    tpu.vector_store %arg4[%c0_70, %140, %c0_71], %143 {strides = array<i32>} : memref<1x8x128xf32, #tpu.memory_space<vmem>>, vector<1x8x128xf32>,
    %c1_i32_72 = arith.constant 1 : i32
    %c0_73 = arith.constant 0 : index
    %c0_74 = arith.constant 0 : index
    %144 = vector.load %arg5[%c0_73, %c0_74] : memref<1x128xf32, #tpu.memory_space<vmem>>, vector<1x128xf32>
    tpu.vector_store %arg5[%c0_73, %c0_74], %130 {strides = array<i32>} : memref<1x128xf32, #tpu.memory_space<vmem>>, vector<1x128xf32>,
    return
  }
  func.func @transform_0(%arg0: i32, %arg1: i32, %arg2: i32) -> (i32, i32, i32) {
    %c0_i32 = arith.constant 0 : i32
    return %arg0, %arg2, %arg1 : i32, i32, i32
  }
  func.func @transform_1(%arg0: i32, %arg1: i32, %arg2: i32) -> (i32, i32, i32) {
    %c0_i32 = arith.constant 0 : i32
    return %arg0, %arg2, %arg1 : i32, i32, i32
  }
}

</mosaic_0001>

<bundles_post_ra>
// kernel: tpu_custom_call.1
= control target key start
LH: loop header
LB: loop body
LE: loop exit
PB: predicated region body
PF: predicated region fallthrough
CT: control target
= control target key end

     0   :  { %6 = vsyncpa [#allocation4], 0  ;;  %s831_s0 = inlined_call_operand.hbm [shape: f32[3,24,128], index: 0, kind: input, shape index: {}]   ;;  %s832_s1 = inlined_call_operand.hbm [shape: f32[3,24,128], index: 1, kind: output, shape index: {}]  }
   0x1   :  { %8 = vsyncpa [#allocation4 + $0x1], 0 }
   0x2   :  { %9 = vsyncpa [#allocation5], 0 }
   0x3   :  { %11 = vsyncpa [#allocation5 + $0x1], 0  ;;  %s647_s6 = smov 0   ;;  %s649_s7 = smov 0  }
   0x4   :  { %s651_s8 = smov 0   ;;  %s653_s9 = smov 0  }
   0x5   :  { %s655_s10 = smov 0   ;;  %s657_s11 = smov 0  }
   0x6   :  { %s659_s12 = smov 0   ;;  %s661_s13 = smov 0  }
   0x7 LB: > { %s404_s14 = sadd.s32 4294967295, %s631_s13   ;;  %s405_s15 = sadd.s32 4294967294, %s631_s13   ;;  %s631_s13 = sphi %s661_s13, %s17_s13   ;;  %s627_s12 = sphi %s659_s12, %s845_s12   ;;  %s623_s11 = sphi %s657_s11, %s844_s11   ;;  %s619_s10 = sphi %s655_s10, %s843_s10   ;;  %s615_s9 = sphi %s653_s9, %s842_s9   ;;  %s611_s8 = sphi %s651_s8, %s841_s8   ;;  %s607_s7 = sphi %s649_s7, %s840_s7   ;;  %s603_s6 = sphi %s647_s6, %s839_s6  }
   0x8   : > { %s29_s16 = sadd.s32 1, %s623_s11  ;;  %s36_s17 = sadd.s32 1, %s627_s12 }
   0x9   : > { %p30_p0 = scmp.ge.s32.totalorder %s29_s16, 3  ;;  %s47_s18 = sadd.s32 1, %s611_s8 }
   0xa   : > { %p54_p1 = scmp.ne.s32.totalorder %s611_s8, %s607_s7  ;;  %p55_p2 = scmp.eq.s32.totalorder %s631_s13, 0 }
   0xb   : > { %s847_s16 = smov (%p30_p0, %s29_s16), 0  ;;  %s849_s17 = smov (!%p30_p0, %s36_s17), %s627_s12 }
   0xc   : > { %s41_s19 = ssub.s32 %s623_s11, %s847_s16  ;;  %p700_p3 = por %p55_p2, %p54_p1 }
   0xd   : > { %p38_p4 = scmp.ge.s32.totalorder %s849_s17, 3  ;;  %p60_p5 = scmp.ne.s32.totalorder %s607_s7, %s603_s6 }
   0xe   : > { %p61_p6 = scmp.eq.s32.totalorder %s404_s14, 0  ;;  %p88_p7 = scmp.eq.s32.totalorder %s404_s14, 8 }
   0xf   : > { %s851_s17 = smov (%p38_p4, %s849_s17), 0  ;;  %p94_p10 = scmp.eq.s32.totalorder %s405_s15, 8 }
  0x10   : > { %p708_p8 = por %p61_p6, %p60_p5  ;;  %p712_p9 = por %p88_p7, %p54_p1 }
  0x11   : > { %s40_s23 = ssub.s32 %s627_s12, %s851_s17  ;;  %p718_p12 = por %p94_p10, %p60_p5 }
  0x12   : > { %s42_s24 = sor.u32 %s41_s19, %s40_s23  ;;  %p439_p13 = scmp.lt.s32.totalorder %s631_s13, 9 }
  0x13   : > { %p45_p11 = scmp.eq.s32.totalorder %s42_s24, 0  ;;  %s114_s26 = sand.u32 1, %s611_s8  }
  0x14   : > { %s836_s25 = scalar_select %p718_p12, 1, 0 }
  0x15   : > { %s725_s27 = scalar_select %p45_p11, %s611_s8, %s47_s18  }
  0x16   : > { %s408_s28 = sshll.u32 %s114_s26, 3  ;;  %s425_s29 = smul.u32 3, %s627_s12 }
  0x17   : > { %s118_s30 = scalar_lea.vmem [#allocation3], %s408_s28  ;;  %p730_p0 = pnand %p439_p13, %p700_p3 }
  0x18   : > { %s128_s2 = sshll.u32 %s118_s30, 4  ;;  %s124_s4 = sadd.s32 %s623_s11, %s425_s29  ;;  %s129_s2 = int_to_ptr.vmem [resolvable:$true] %s128_s2 }
  0x19   : > { %s409_s5 = sshll.u32 %s124_s4, 7  ;;  %p410_p1 = scmp.ge.s32.totalorder %s631_s13, 1 }
  0x1a   : > { %s126_s19 = scalar_lea.hbm %s831_s0, %s409_s5  ;;  %s115_s18 = scalar_lea.sflag [#allocation4], %s114_s26 }
  0x1b   : > { %p509_p2 = pneg %p730_p0  ;;  %s520_s23 = scalar_lea.vmem %s129_s2, 128 }
  0x1c   : > { %p521_p4 = scmp.ne.s32.totalorder %s129_s2, %s520_s23  ;;  %s633_s20 = smov [#allocation3]  }
  0x1d   : > { %s525_s24 = sshll.u32 %s633_s20, 4  ;;  %s526_s24 = int_to_ptr.vmem [resolvable:$false] %s525_s24 }
  0x1e   : > { %p523_p5 = pnand %p521_p4, %p509_p2  ;;  %s527_s28 = scalar_lea.vmem %s526_s24, 256 }
  0x1f   : > { %p528_p3 = scmp.lt.s32.totalorder %s129_s2, %s526_s24  ;;  %p529_p7 = scmp.lt.s32.totalorder %s527_s28, %s520_s23 }
  0x20   : > { %p524_p6 = pneg %p523_p5 }
  0x21   : > { %p530_p10 = por %p529_p7, %p528_p3 }
  0x23   : > { %p531_p11 = pnand %p530_p10, %p524_p6 }
  0x25   : > { %534 = shalt.err (!%p531_p11)
}
  0x26   : > { %434 = dma.hbm_to_vmem [thread:$0]  (!%p730_p0), %s126_s19, 128, %s129_s2, %s115_s18  }
  0x27   : > { %p133_p13 = scmp.lt.s32.totalorder %s631_s13, 10 }
  0x29   : > { %p134_p12 = pnand %p410_p1, %p133_p13 }
  0x2a   : > { %s747_s26 = sand.u32 (!%p134_p12), 1, %s607_s7  }
  0x2b   : > { %137 = sbr.rel (%p134_p12) target bundleno = 131 (0x83), region = 24  ;;  %s411_s29 = sshll.u32 (!%p134_p12), %s747_s26, 3 }
  0x2c   : > { %s140_s30 = scalar_lea.sflag (!%p134_p12), [#allocation4], %s747_s26  ;;  %s751_s4 = scalar_lea.vmem (!%p134_p12), [#allocation3], %s411_s29 }
  0x30   : > { %594 = dma.done.wait (%p708_p8), %s140_s30, 128  }
  0x31   : > { %596 = vsyncadd (%p708_p8), %s140_s30, 4294967168  ;;  %s757_s2 = scalar_lea.vmem [#allocation6], %s411_s29  ;;  %p413_p0 = scmp.ne.s32.totalorder %s615_s9, 0 }
  0x33   : > { %165 = sbr.rel (%p413_p0) target bundleno = 58 (0x3a), region = 32 }
  0x38   : > { %v634_v0 = vmov 0.0  }
  0x39   : > { %166 = vst [vmem:[#allocation2] sm:$0x1] %v634_v0 }
  0x3a PF: > { %v170_v2 = vld [vmem:[%s751_s4] sm:$0x1]  ;;  %v635_v4 = vmov 0.0   ;;  %v414_v8 = vld [vmem:[%s751_s4 + $0x1] sm:$0x1]  ;;  %v233_v20 = vlaneseq  ;;  %vm274_vm6 = vcmask 1040384  }
  0x3b   : > { %v415_v13 = vld [vmem:[%s751_s4 + $0x2] sm:$0x1]  ;;  %v416_v18 = vld [vmem:[%s751_s4 + $0x3] sm:$0x1]  ;;  %v417_v25 = vld [vmem:[%s751_s4 + $0x4] sm:$0x1] }
  0x3c   : > { %v234_v24 = vshrl.u32 %v233_v20, 7  ;;  %v418_v31 = vld [vmem:[%s751_s4 + $0x5] sm:$0x1]  ;;  %vm276_vm7 = vcmask 1041408   ;;  %v419_v39 = vld [vmem:[%s751_s4 + $0x6] sm:$0x1] }
  0x3d   : > { %vm278_vm9 = vcmask 1042432   ;;  %vm280_vm10 = vcmask 1043456   ;;  %v420_v48 = vld [vmem:[%s751_s4 + $0x7] sm:$0x1]  ;;  %s426_s21 = smul.u32 3, %s619_s10  ;;  %vm282_vm12 = vcmask 1044480  }
  0x3e   : > { %v235_v29 = vsub.s32 0, %v234_v24  ;;  %vm284_vm13 = vcmask 1045504   ;;  %s307_s5 = sshll.u32 %s757_s2, 4  ;;  %vm286_vm15 = vcmask 1046528   ;;  %s636_s23 = smov [#allocation6]   ;;  %s308_s5 = int_to_ptr.vmem [resolvable:$true] %s307_s5 }
  0x3f   : > { %s303_s3 = sadd.s32 %s615_s9, %s426_s21  ;;  %s291_s9 = scalar_lea.sflag [#allocation5], %s747_s26 }
  0x40   : > { %v167_v1 = vld [vmem:[#allocation2] sm:$0x1]  ;;  %s422_s10 = sshll.u32 %s303_s3, 7  ;;  %s535_s18 = scalar_lea.vmem %s308_s5, 128 }
  0x41   : > { %vm168_vm0 = vcmp.gt.f32.partialorder %v167_v1, 1.0  ;;  %v171_v3 = vmul.f32 0.95, %v167_v1  ;;  %s783_s19 = scalar_lea.hbm %s832_s1, %s422_s10  ;;  %p536_p8 = scmp.ne.s32.totalorder %s308_s5, %s535_s18 }
  0x42   : > { %v169_v5 = vsel %vm168_vm0, 1.0, %v635_v4  ;;  %s539_s20 = sshll.u32 %s636_s23, 4  ;;  %s540_s20 = int_to_ptr.vmem [resolvable:$false] %s539_s20 }
  0x43   : > { %v172_v6 = vadd.f32 %v171_v3, %v170_v2  ;;  %p537_p12 = pnand %p536_p8, %p712_p9  ;;  %s541_s24 = scalar_lea.vmem %s540_s20, 256 }
  0x44   : > { %p542_p2 = scmp.lt.s32.totalorder %s308_s5, %s540_s20  ;;  %p543_p4 = scmp.lt.s32.totalorder %s541_s24, %s535_s18 }
  0x45   : > { %v173_v7 = vsub.f32 %v172_v6, %v169_v5  ;;  %p538_p1 = pneg %p537_p12 }
  0x46   : > { %p544_p5 = por %p543_p4, %p542_p2 }
  0x47   : > { %vm174_vm1 = vcmp.gt.f32.partialorder %v173_v7, 1.0  ;;  %v179_v9 = vmul.f32 0.95, %v173_v7 }
  0x48   : > { %v175_v10 = vsel %vm174_vm1, 1.0, %v635_v4  ;;  %p545_p6 = pnand %p544_p5, %p538_p1 }
  0x49   : > { %v180_v11 = vadd.f32 %v414_v8, %v179_v9 }
  0x4b   : > { %v181_v12 = vsub.f32 %v180_v11, %v175_v10 }
  0x4d   : > { %vm182_vm2 = vcmp.gt.f32.partialorder %v181_v12, 1.0  ;;  %v187_v14 = vmul.f32 0.95, %v181_v12 }
  0x4e   : > { %v183_v15 = vsel %vm182_vm2, 1.0, %v635_v4 }
  0x4f   : > { %v188_v16 = vadd.f32 %v415_v13, %v187_v14  ;;  %v236_v33 = vrot.slane %v183_v15, %v235_v29 }
  0x51   : > { %v189_v17 = vsub.f32 %v188_v16, %v183_v15  ;;  %v275_v38 = vsel %vm274_vm6, %v175_v10, %v236_v33 }
  0x53   : > { %vm190_vm3 = vcmp.gt.f32.partialorder %v189_v17, 1.0  ;;  %v195_v19 = vmul.f32 0.95, %v189_v17 }
  0x54   : > { %v191_v21 = vsel %vm190_vm3, 1.0, %v635_v4 }
  0x55   : > { %v196_v22 = vadd.f32 %v416_v18, %v195_v19  ;;  %v242_v36 = vrot.slane %v191_v21, %v235_v29 }
  0x57   : > { %v197_v23 = vsub.f32 %v196_v22, %v191_v21  ;;  %v277_v43 = vsel %vm276_vm7, %v275_v38, %v242_v36 }
  0x59   : > { %vm198_vm4 = vcmp.gt.f32.partialorder %v197_v23, 1.0  ;;  %v203_v26 = vmul.f32 0.95, %v197_v23 }
  0x5a   : > { %v199_v27 = vsel %vm198_vm4, 1.0, %v635_v4 }
  0x5b   : > { %v204_v28 = vadd.f32 %v417_v25, %v203_v26  ;;  %v248_v41 = vrot.slane %v199_v27, %v235_v29 }
  0x5d   : > { %v205_v30 = vsub.f32 %v204_v28, %v199_v27  ;;  %v279_v47 = vsel %vm278_vm9, %v277_v43, %v248_v41 }
  0x5f   : > { %vm206_vm5 = vcmp.gt.f32.partialorder %v205_v30, 1.0  ;;  %v211_v32 = vmul.f32 0.95, %v205_v30 }
  0x60   : > { %v207_v34 = vsel %vm206_vm5, 1.0, %v635_v4 }
  0x61   : > { %v212_v35 = vadd.f32 %v418_v31, %v211_v32  ;;  %v254_v45 = vrot.slane %v207_v34, %v235_v29 }
  0x63   : > { %v213_v37 = vsub.f32 %v212_v35, %v207_v34  ;;  %v281_v52 = vsel %vm280_vm10, %v279_v47, %v254_v45 }
  0x65   : > { %vm214_vm8 = vcmp.gt.f32.partialorder %v213_v37, 1.0  ;;  %v219_v40 = vmul.f32 0.95, %v213_v37 }
  0x66   : > { %v215_v42 = vsel %vm214_vm8, 1.0, %v635_v4 }
  0x67   : > { %v220_v44 = vadd.f32 %v419_v39, %v219_v40  ;;  %v260_v50 = vrot.slane %v215_v42, %v235_v29 }
  0x69   : > { %v221_v46 = vsub.f32 %v220_v44, %v215_v42  ;;  %v283_v56 = vsel %vm282_vm12, %v281_v52, %v260_v50 }
  0x6b   : > { %vm222_vm11 = vcmp.gt.f32.partialorder %v221_v46, 1.0  ;;  %v227_v49 = vmul.f32 0.95, %v221_v46 }
  0x6c   : > { %v223_v51 = vsel %vm222_vm11, 1.0, %v635_v4 }
  0x6d   : > { %v228_v53 = vadd.f32 %v420_v48, %v227_v49  ;;  %v266_v54 = vrot.slane %v223_v51, %v235_v29 }
  0x6f   : > { %v229_v55 = vsub.f32 %v228_v53, %v223_v51  ;;  %v285_v58 = vsel %vm284_vm13, %v283_v56, %v266_v54 }
  0x71   : > { %vm230_vm14 = vcmp.gt.f32.partialorder %v229_v55, 1.0  ;;  %289 = vst [vmem:[#allocation2] sm:$0x1] %v229_v55 }
  0x72   : > { %v231_v57 = vsel %vm230_vm14, 1.0, %v635_v4 }
  0x73   : > { %v272_v59 = vrot.slane %v231_v57, %v235_v29 }
  0x75   : > { %v287_v60 = vsel %vm286_vm15, %v285_v58, %v272_v59 }
  0x76   : > { %288 = vst [vmem:[%s757_s2] sm:$0xff] %v287_v60 }
  0x77   : > { %548 = shalt.err (!%p545_p6)
}
  0x78   : > { %s549_s28 = scalar_lea.hbm %s783_s19, 128  ;;  %s553_s30 = scalar_lea.hbm %s832_s1, 1152 }
  0x79   : > { %p550_p3 = scmp.ne.s32.totalorder %s783_s19, %s549_s28  ;;  %p554_p11 = scmp.lt.s32.totalorder %s783_s19, %s832_s1 }
  0x7a   : > { %p555_p13 = scmp.lt.s32.totalorder %s553_s30, %s549_s28 }
  0x7b   : > { %p551_p7 = pnand %p550_p3, %p712_p9 }
  0x7c   : > { %p556_p0 = por %p555_p13, %p554_p11 }
  0x7d   : > { %p552_p10 = pneg %p551_p7 }
  0x7f   : > { %p557_p8 = pnand %p556_p0, %p552_p10 }
  0x81   : > { %560 = shalt.err (!%p557_p8)
}
  0x82   : > { %429 = dma.vmem_to_hbm [thread:$0]  (%p712_p9), %s308_s5, 128, %s783_s19, %s291_s9  }
  0x83 PF: > { %p440_p12 = scmp.ge.s32.totalorder %s631_s13, 2  ;;  %s319_s21 = sand.u32 1, %s603_s6  }
  0x84   : > { %p838_p1 = scmp.ne.s32.totalorder %s836_s25, 0  ;;  %s320_s3 = scalar_lea.sflag [#allocation5], %s319_s21 }
  0x86   : > { %p436_p2 = pnand %p440_p12, %p838_p1 }
  0x88   : > { %p437_p4 = pneg %p436_p2 }
  0x8a   : > { %598 = dma.done.wait (%p437_p4), %s320_s3, 128  }
  0x8b   : > { %600 = vsyncadd (%p437_p4), %s320_s3, 4294967168  ;;  %s17_s13 = sadd.s32 1, %s631_s13   ;;  %s839_s6 = smov %s607_s7 }
  0x8c   : > { %p14_p5 = scmp.ge.s32.totalorder %s17_s13, 11   ;;  %s840_s7 = smov %s611_s8 }
  0x8d   : > { %s841_s8 = smov %s725_s27  ;;  %s842_s9 = smov %s623_s11 }
  0x8e   : > { %s843_s10 = smov %s627_s12  ;;  %s844_s11 = smov %s847_s16 }
  0x8f   : > { %s845_s12 = smov %s851_s17  ;;  %16 = sbr.rel (!%p14_p5) target bundleno = 7 (0x7), region = 80 }
  0x94   :  { %325 = vsyncpa [#allocation4], 1 }
  0x95   :  { %327 = vsyncpa [#allocation4 + $0x1], 1 }
  0x96   :  { %328 = vsyncpa [#allocation5], 1 }
  0x97   :  { %330 = vsyncpa [#allocation5 + $0x1], 1 }

</bundles_post_ra>
